<compile_context>
chip_gen: v7x
topology: tpu7x:2x2x1
jax: 0.10.0
libtpu: 0.0.40
codegen_flags: <defaults>
</compile_context>

<pallas_src>
import numpy as np
import jax
import jax.numpy as jnp
from jax.experimental import pallas as pl
from jax.experimental.pallas import tpu as pltpu

# ---------------- synthetic model configuration ----------------
B, C_IN, H, W = 2, 4, 16, 16
PATCH = 4
NH, NW = H // PATCH, W // PATCH
P = NH * NW                 # tokens per image (16)
D = 32                      # embedding dim
HID = 64                    # MLP hidden dim
NC = 5                      # number of segmentation classes
HW = H * W                  # 256 output pixels per image
PD = C_IN * PATCH * PATCH   # 64 patch-vector length
BP = B * P                  # 32 total tokens
BHW = B * HW                # 512 total output pixels

# ---- single parameter slab layout (rows x 128 lanes, bf16) ----
# rows 0:32        lanes   0:64  -> wpeT (D, PD)
# rows 0:32        lanes  64:128 -> w2T  (D, HID)
# rows 32:96       lanes   0:32  -> w1T  (HID, D)
# rows 32:96       lane   32     -> b1   (HID, 1)
# rows 32:64       lane   40     -> bpe  (D, 1)
# rows 32:64       lane   41     -> b2   (D, 1)
# rows 96:101      lanes   0:32  -> whT  (NC, D)
# rows 96:101      lane   32     -> bh   (NC, 1)
SLAB_ROWS = D + HID + 8     # 104
LANE_B1 = D                 # 32
LANE_BPE = 40
LANE_B2 = 41
LANE_BH = D                 # 32


def _gelu_tanh(x):
    # tanh-approx GELU, kept in f32 (v5e VPU/EUP have no bf16 path).
    return 0.5 * x * (1.0 + jnp.tanh(0.7978845608028654 * (x + 0.044715 * x * x * x)))


# ---------------- single fused Pallas kernel ----------------
def fused_kernel(patchesT_ref, slab_ref, mup_ref, out_ref):
    f32 = jnp.float32
    bf16 = jnp.bfloat16

    # Static slices of the consolidated parameter slab (zero-cost views; the
    # bias columns sit in otherwise-padding lanes, so no extra DMA bytes).
    wpeT = slab_ref[0:D, 0:PD]                              # (D, PD)   bf16
    w2T = slab_ref[0:D, PD:PD + HID]                        # (D, HID)  bf16
    w1T = slab_ref[D:D + HID, 0:D]                          # (HID, D)  bf16
    b1 = slab_ref[D:D + HID, LANE_B1:LANE_B1 + 1]           # (HID, 1)  bf16
    bpe = slab_ref[D:2 * D, LANE_BPE:LANE_BPE + 1]          # (D, 1)    bf16
    b2 = slab_ref[D:2 * D, LANE_B2:LANE_B2 + 1]             # (D, 1)    bf16
    whT = slab_ref[D + HID:D + HID + NC, 0:D]               # (NC, D)   bf16
    bh = slab_ref[D + HID:D + HID + NC, LANE_BH:LANE_BH + 1]  # (NC, 1)  bf16

    patchesT = patchesT_ref[...]                            # (PD, BP)  bf16

    # tokenizer: patch-embedding matmul (== Conv2d(C_IN, D, PATCH, stride=PATCH))
    # All dots: bf16 operands, f32 accumulation on the MXU.
    tokT = jnp.dot(wpeT, patchesT, preferred_element_type=f32) + bpe          # (D, BP) f32
    # backbone: one residual MLP block (tanh GELU, f32 elementwise chain)
    hT = _gelu_tanh(jnp.dot(w1T, tokT.astype(bf16),
                            preferred_element_type=f32) + b1)                 # (HID, BP) f32
    yT = tokT + jnp.dot(w2T, hT.astype(bf16), preferred_element_type=f32) + b2  # (D, BP) f32
    # taskHead: 1x1 conv over the dense token map == linear over features
    headT = jnp.dot(whT, yT.astype(bf16), preferred_element_type=f32) + bh    # (NC, BP) f32

    mup = mup_ref[...]                                      # (P, HW) bf16, shared across batch

    # Per-image bilinear upsample + argmax.  The softmax of the reference
    # module is dropped: monotonic per pixel, so argmax is unchanged.
    for b in range(B):
        head_b = headT[:, b * P:(b + 1) * P].astype(bf16)                     # (NC, P)
        up = jnp.dot(head_b, mup, preferred_element_type=f32)                 # (NC, HW) f32

        # Unrolled argmax over the NC=5 sublanes; strict '>' keeps the first
        # occurrence on ties (matches torch.argmax / jnp.argmax).  Scalar
        # constants in jnp.where avoid per-iteration broadcasts.
        best_val = up[0:1, :]
        best_idx = jnp.zeros((1, HW), dtype=jnp.int32)
        for c in range(1, NC):
            cur = up[c:c + 1, :]
            take = cur > best_val
            best_val = jnp.where(take, cur, best_val)
            best_idx = jnp.where(take, c, best_idx)

        # 128-aligned, 256-lane unmasked int32 store.
        out_ref[:, b * HW:(b + 1) * HW] = best_idx


# ---------------- host-side glue ----------------
def extract_patches(x):
    # x: (B, C_IN, H, W) NCHW -> (B*P, C_IN*PATCH*PATCH); patch vector laid
    # out in (C, ph, pw) order, matching PyTorch Conv2d weight flattening.
    xp = x.reshape(B, C_IN, NH, PATCH, NW, PATCH)
    xp = xp.transpose(0, 2, 4, 1, 3, 5)            # (B, NH, NW, C, ph, pw)
    return xp.reshape(B * P, PD)


def bilinear_matrix(out_size, in_size):
    # F.interpolate(mode='bilinear', align_corners=False) source-index rule.
    A = np.zeros((out_size, in_size), np.float32)
    scale = in_size / out_size
    for o in range(out_size):
        src = (o + 0.5) * scale - 0.5
        src = max(src, 0.0)
        i0 = min(int(np.floor(src)), in_size - 1)
        i1 = min(i0 + 1, in_size - 1)
        lam = src - i0
        A[o, i0] += 1.0 - lam
        A[o, i1] += lam
    return A


def forward_test(x, label, slab, mup_bf):
    # == PeModel_Forseg.forward(x, label, is_train=False)
    patchesT = extract_patches(x).T.astype(jnp.bfloat16)    # (PD, BP), features-on-sublanes
    vmem = pl.BlockSpec(memory_space=pltpu.MemorySpace.VMEM)
    seg_flat = pl.pallas_call(
        fused_kernel,
        out_shape=jax.ShapeDtypeStruct((1, BHW), jnp.int32),
        in_specs=[vmem, vmem, vmem],
        out_specs=vmem,
    )(patchesT, slab, mup_bf)
    return seg_flat.reshape(B, label.shape[1], label.shape[2])


# ---------------- main ----------------
if __name__ == "__main__":
    key = jax.random.PRNGKey(0)
    kx, kl, kp = jax.random.split(key, 3)
    x = jax.random.normal(kx, (B, C_IN, H, W), jnp.float32)
    label = jax.random.randint(kl, (B, H, W), 0, NC, jnp.int32)

    ks = jax.random.split(kp, 8)

    def init(k, shape, fan_in):
        return (jax.random.normal(k, shape, jnp.float32) / np.sqrt(fan_in)).astype(jnp.float32)

    params = {
        "wpe": init(ks[0], (PD, D), PD),
        "bpe": init(ks[1], (1, D), 1.0),
        "w1":  init(ks[2], (D, HID), D),
        "b1":  init(ks[3], (1, HID), 1.0),
        "w2":  init(ks[4], (HID, D), HID),
        "b2":  init(ks[5], (1, D), 1.0),
        "wh":  init(ks[6], (D, NC), D),
        "bh":  init(ks[7], (1, NC), 1.0),
    }

    # bf16 transposed parameters (features-on-sublanes layout used by the kernel)
    wpeT_bf = params["wpe"].T.astype(jnp.bfloat16)   # (D, PD)
    w1T_bf = params["w1"].T.astype(jnp.bfloat16)     # (HID, D)
    w2T_bf = params["w2"].T.astype(jnp.bfloat16)     # (D, HID)
    whT_bf = params["wh"].T.astype(jnp.bfloat16)     # (NC, D)
    bpe_bf = params["bpe"].T.astype(jnp.bfloat16)    # (D, 1)
    b1_bf = params["b1"].T.astype(jnp.bfloat16)      # (HID, 1)
    b2_bf = params["b2"].T.astype(jnp.bfloat16)      # (D, 1)
    bh_bf = params["bh"].T.astype(jnp.bfloat16)      # (NC, 1)

    # Single lane-dense bf16 parameter slab (biases ride in padding lanes).
    slab = jnp.zeros((SLAB_ROWS, 128), jnp.bfloat16)
    slab = slab.at[0:D, 0:PD].set(wpeT_bf)
    slab = slab.at[0:D, PD:PD + HID].set(w2T_bf)
    slab = slab.at[D:D + HID, 0:D].set(w1T_bf)
    slab = slab.at[D:D + HID, LANE_B1:LANE_B1 + 1].set(b1_bf)
    slab = slab.at[D:2 * D, LANE_BPE:LANE_BPE + 1].set(bpe_bf)
    slab = slab.at[D:2 * D, LANE_B2:LANE_B2 + 1].set(b2_bf)
    slab = slab.at[D + HID:D + HID + NC, 0:D].set(whT_bf)
    slab = slab.at[D + HID:D + HID + NC, LANE_BH:LANE_BH + 1].set(bh_bf)

    # Shared per-image bilinear interpolation matrix (tokens -> flat pixels),
    # no eye(B) block-diagonal; applied once per batch element in the kernel.
    A_h = bilinear_matrix(H, NH)
    A_w = bilinear_matrix(W, NW)
    M = np.kron(A_h, A_w)                                   # (HW, P)
    mup_bf = jnp.asarray(M.T, jnp.bfloat16)                 # (P, HW)

    seg = forward_test(x, label, slab, mup_bf)
    seg = jax.block_until_ready(seg)

    # ---------------- pure-JAX reference (mirrors the kernel math) ----------------
    patchesT_bf = extract_patches(x).T.astype(jnp.bfloat16)
    tokT = jnp.dot(wpeT_bf, patchesT_bf, preferred_element_type=jnp.float32) + bpe_bf
    hT = _gelu_tanh(jnp.dot(w1T_bf, tokT.astype(jnp.bfloat16),
                            preferred_element_type=jnp.float32) + b1_bf)
    yT = tokT + jnp.dot(w2T_bf, hT.astype(jnp.bfloat16),
                        preferred_element_type=jnp.float32) + b2_bf
    headT = jnp.dot(whT_bf, yT.astype(jnp.bfloat16),
                    preferred_element_type=jnp.float32) + bh_bf             # (NC, BP)
    up_ref = jnp.stack(
        [jnp.dot(headT[:, b * P:(b + 1) * P].astype(jnp.bfloat16), mup_bf,
                 preferred_element_type=jnp.float32) for b in range(B)],
        axis=0)                                                             # (B, NC, HW)
    # Reference keeps the module's (mathematically redundant) softmax.
    ref_seg = jnp.argmax(jax.nn.softmax(up_ref, axis=1), axis=1).astype(jnp.int32)  # (B, HW)

    assert seg.shape == (B, H, W) and seg.dtype == jnp.int32
    seg2 = seg.reshape(B, HW)
    exact = seg2 == ref_seg
    # Near-tie tolerance: Pallas EUP tanh / MXU ordering may differ from XLA by
    # ULPs, which can flip argmax only where two class logits are ~equal.
    chosen = jnp.take_along_axis(up_ref, seg2[:, None, :], axis=1)[:, 0, :]
    margin = jnp.max(up_ref, axis=1) - chosen
    ok = exact | (margin <= 1e-3)
    assert bool(jnp.all(ok)), "Pallas result differs from reference beyond near-tie tolerance"
    assert float(jnp.mean(~exact)) < 0.02, "too many mismatched pixels vs reference"
    print("KERNEL_OK")
</pallas_src>

<mosaic_0001>
module attributes {stable_mosaic.version = 11 : i64} {
  func.func @fused_kernel(%arg0: memref<64x32xbf16, #tpu.memory_space<vmem>>, %arg1: memref<104x128xbf16, #tpu.memory_space<vmem>>, %arg2: memref<16x256xbf16, #tpu.memory_space<vmem>>, %arg3: memref<1x512xi32, #tpu.memory_space<vmem>>) attributes {dimension_semantics = [], scalar_prefetch = 0 : i64, scratch_operands = 0 : i64, tpu.core_type = #tpu.core_type<tc>} {
    %c0 = arith.constant 0 : index
    %c0_0 = arith.constant 0 : index
    %0 = vector.load %arg1[%c0, %c0_0] : memref<104x128xbf16, #tpu.memory_space<vmem>>, vector<32x64xbf16>
    %c0_1 = arith.constant 0 : index
    %c64 = arith.constant 64 : index
    %1 = vector.load %arg1[%c0_1, %c64] : memref<104x128xbf16, #tpu.memory_space<vmem>>, vector<32x64xbf16>
    %c32 = arith.constant 32 : index
    %c0_2 = arith.constant 0 : index
    %2 = vector.load %arg1[%c32, %c0_2] : memref<104x128xbf16, #tpu.memory_space<vmem>>, vector<64x32xbf16>
    %c32_3 = arith.constant 32 : index
    %c32_4 = arith.constant 32 : index
    %3 = vector.load %arg1[%c32_3, %c32_4] : memref<104x128xbf16, #tpu.memory_space<vmem>>, vector<64x1xbf16>
    %c32_5 = arith.constant 32 : index
    %c40 = arith.constant 40 : index
    %4 = vector.load %arg1[%c32_5, %c40] : memref<104x128xbf16, #tpu.memory_space<vmem>>, vector<32x1xbf16>
    %c32_6 = arith.constant 32 : index
    %c41 = arith.constant 41 : index
    %5 = vector.load %arg1[%c32_6, %c41] : memref<104x128xbf16, #tpu.memory_space<vmem>>, vector<32x1xbf16>
    %c96 = arith.constant 96 : index
    %c0_7 = arith.constant 0 : index
    %6 = vector.load %arg1[%c96, %c0_7] : memref<104x128xbf16, #tpu.memory_space<vmem>>, vector<5x32xbf16>
    %c96_8 = arith.constant 96 : index
    %c32_9 = arith.constant 32 : index
    %7 = vector.load %arg1[%c96_8, %c32_9] : memref<104x128xbf16, #tpu.memory_space<vmem>>, vector<5x1xbf16>
    %c0_10 = arith.constant 0 : index
    %c0_11 = arith.constant 0 : index
    %8 = vector.load %arg0[%c0_10, %c0_11] : memref<64x32xbf16, #tpu.memory_space<vmem>>, vector<64x32xbf16>
    %cst = arith.constant dense<0.000000e+00> : vector<32x32xf32>
    %9 = tpu.matmul %0, %8, %cst {dimension_numbers = #tpu.dot_dimension_numbers<[1], [0], [0], [1], [0, 0, 1, 1], [], []>} : vector<32x64xbf16>, vector<64x32xbf16>, vector<32x32xf32> -> vector<32x32xf32>
    %10 = arith.extf %4 : vector<32x1xbf16> to vector<32x1xf32>
    %11 = vector.broadcast %10 : vector<32x1xf32> to vector<32x32xf32>
    %12 = arith.addf %9, %11 : vector<32x32xf32>
    %13 = arith.truncf %12 : vector<32x32xf32> to vector<32x32xbf16>
    %cst_12 = arith.constant dense<0.000000e+00> : vector<64x32xf32>
    %14 = tpu.matmul %2, %13, %cst_12 {dimension_numbers = #tpu.dot_dimension_numbers<[1], [0], [0], [1], [0, 0, 1, 1], [], []>} : vector<64x32xbf16>, vector<32x32xbf16>, vector<64x32xf32> -> vector<64x32xf32>
    %15 = arith.extf %3 : vector<64x1xbf16> to vector<64x1xf32>
    %16 = vector.broadcast %15 : vector<64x1xf32> to vector<64x32xf32>
    %17 = arith.addf %14, %16 : vector<64x32xf32>
    %cst_13 = arith.constant 5.000000e-01 : f32
    %18 = vector.broadcast %cst_13 : f32 to vector<64x32xf32>
    %19 = arith.mulf %18, %17 : vector<64x32xf32>
    %cst_14 = arith.constant 4.471500e-02 : f32
    %20 = vector.broadcast %cst_14 : f32 to vector<64x32xf32>
    %21 = arith.mulf %20, %17 : vector<64x32xf32>
    %22 = arith.mulf %21, %17 : vector<64x32xf32>
    %23 = arith.mulf %22, %17 : vector<64x32xf32>
    %24 = arith.addf %17, %23 : vector<64x32xf32>
    %cst_15 = arith.constant 0.797884583 : f32
    %25 = vector.broadcast %cst_15 : f32 to vector<64x32xf32>
    %26 = arith.mulf %25, %24 : vector<64x32xf32>
    %27 = math.tanh %26 : vector<64x32xf32>
    %cst_16 = arith.constant 1.000000e+00 : f32
    %28 = vector.broadcast %cst_16 : f32 to vector<64x32xf32>
    %29 = arith.addf %28, %27 : vector<64x32xf32>
    %30 = arith.mulf %19, %29 : vector<64x32xf32>
    %31 = arith.truncf %30 : vector<64x32xf32> to vector<64x32xbf16>
    %cst_17 = arith.constant dense<0.000000e+00> : vector<32x32xf32>
    %32 = tpu.matmul %1, %31, %cst_17 {dimension_numbers = #tpu.dot_dimension_numbers<[1], [0], [0], [1], [0, 0, 1, 1], [], []>} : vector<32x64xbf16>, vector<64x32xbf16>, vector<32x32xf32> -> vector<32x32xf32>
    %33 = arith.addf %12, %32 : vector<32x32xf32>
    %34 = arith.extf %5 : vector<32x1xbf16> to vector<32x1xf32>
    %35 = vector.broadcast %34 : vector<32x1xf32> to vector<32x32xf32>
    %36 = arith.addf %33, %35 : vector<32x32xf32>
    %37 = arith.truncf %36 : vector<32x32xf32> to vector<32x32xbf16>
    %cst_18 = arith.constant dense<0.000000e+00> : vector<5x32xf32>
    %38 = tpu.matmul %6, %37, %cst_18 {dimension_numbers = #tpu.dot_dimension_numbers<[1], [0], [0], [1], [0, 0, 1, 1], [], []>} : vector<5x32xbf16>, vector<32x32xbf16>, vector<5x32xf32> -> vector<5x32xf32>
    %39 = arith.extf %7 : vector<5x1xbf16> to vector<5x1xf32>
    %40 = vector.broadcast %39 : vector<5x1xf32> to vector<5x32xf32>
    %41 = arith.addf %38, %40 : vector<5x32xf32>
    %c0_19 = arith.constant 0 : index
    %c0_20 = arith.constant 0 : index
    %42 = vector.load %arg2[%c0_19, %c0_20] : memref<16x256xbf16, #tpu.memory_space<vmem>>, vector<16x256xbf16>
    %43 = vector.extract_strided_slice %41 {offsets = [0, 0], sizes = [5, 16], strides = [1, 1]} : vector<5x32xf32> to vector<5x16xf32>
    %44 = arith.truncf %43 : vector<5x16xf32> to vector<5x16xbf16>
    %cst_21 = arith.constant dense<0.000000e+00> : vector<5x256xf32>
    %45 = tpu.matmul %44, %42, %cst_21 {dimension_numbers = #tpu.dot_dimension_numbers<[1], [0], [0], [1], [0, 0, 1, 1], [], []>} : vector<5x16xbf16>, vector<16x256xbf16>, vector<5x256xf32> -> vector<5x256xf32>
    %46 = vector.extract_strided_slice %45 {offsets = [0, 0], sizes = [1, 256], strides = [1, 1]} : vector<5x256xf32> to vector<1x256xf32>
    %c0_i32 = arith.constant 0 : i32
    %47 = vector.broadcast %c0_i32 : i32 to vector<1x256xi32>
    %48 = vector.extract_strided_slice %45 {offsets = [1, 0], sizes = [1, 256], strides = [1, 1]} : vector<5x256xf32> to vector<1x256xf32>
    %49 = arith.cmpf ogt, %48, %46 : vector<1x256xf32>
    %50 = arith.select %49, %48, %46 : vector<1x256xi1>, vector<1x256xf32>
    %c1_i32 = arith.constant 1 : i32
    %51 = vector.broadcast %c1_i32 : i32 to vector<1x256xi32>
    %52 = arith.select %49, %51, %47 : vector<1x256xi1>, vector<1x256xi32>
    %53 = vector.extract_strided_slice %45 {offsets = [2, 0], sizes = [1, 256], strides = [1, 1]} : vector<5x256xf32> to vector<1x256xf32>
    %54 = arith.cmpf ogt, %53, %50 : vector<1x256xf32>
    %55 = arith.select %54, %53, %50 : vector<1x256xi1>, vector<1x256xf32>
    %c2_i32 = arith.constant 2 : i32
    %56 = vector.broadcast %c2_i32 : i32 to vector<1x256xi32>
    %57 = arith.select %54, %56, %52 : vector<1x256xi1>, vector<1x256xi32>
    %58 = vector.extract_strided_slice %45 {offsets = [3, 0], sizes = [1, 256], strides = [1, 1]} : vector<5x256xf32> to vector<1x256xf32>
    %59 = arith.cmpf ogt, %58, %55 : vector<1x256xf32>
    %60 = arith.select %59, %58, %55 : vector<1x256xi1>, vector<1x256xf32>
    %c3_i32 = arith.constant 3 : i32
    %61 = vector.broadcast %c3_i32 : i32 to vector<1x256xi32>
    %62 = arith.select %59, %61, %57 : vector<1x256xi1>, vector<1x256xi32>
    %63 = vector.extract_strided_slice %45 {offsets = [4, 0], sizes = [1, 256], strides = [1, 1]} : vector<5x256xf32> to vector<1x256xf32>
    %64 = arith.cmpf ogt, %63, %60 : vector<1x256xf32>
    %c4_i32 = arith.constant 4 : i32
    %65 = vector.broadcast %c4_i32 : i32 to vector<1x256xi32>
    %66 = arith.select %64, %65, %62 : vector<1x256xi1>, vector<1x256xi32>
    %c0_22 = arith.constant 0 : index
    %c0_23 = arith.constant 0 : index
    %67 = vector.load %arg3[%c0_22, %c0_23] : memref<1x512xi32, #tpu.memory_space<vmem>>, vector<1x256xi32>
    tpu.vector_store %arg3[%c0_22, %c0_23], %66 {strides = array<i32>} : memref<1x512xi32, #tpu.memory_space<vmem>>, vector<1x256xi32>,
    %68 = vector.extract_strided_slice %41 {offsets = [0, 16], sizes = [5, 16], strides = [1, 1]} : vector<5x32xf32> to vector<5x16xf32>
    %69 = arith.truncf %68 : vector<5x16xf32> to vector<5x16xbf16>
    %cst_24 = arith.constant dense<0.000000e+00> : vector<5x256xf32>
    %70 = tpu.matmul %69, %42, %cst_24 {dimension_numbers = #tpu.dot_dimension_numbers<[1], [0], [0], [1], [0, 0, 1, 1], [], []>} : vector<5x16xbf16>, vector<16x256xbf16>, vector<5x256xf32> -> vector<5x256xf32>
    %71 = vector.extract_strided_slice %70 {offsets = [0, 0], sizes = [1, 256], strides = [1, 1]} : vector<5x256xf32> to vector<1x256xf32>
    %c0_i32_25 = arith.constant 0 : i32
    %72 = vector.broadcast %c0_i32_25 : i32 to vector<1x256xi32>
    %73 = vector.extract_strided_slice %70 {offsets = [1, 0], sizes = [1, 256], strides = [1, 1]} : vector<5x256xf32> to vector<1x256xf32>
    %74 = arith.cmpf ogt, %73, %71 : vector<1x256xf32>
    %75 = arith.select %74, %73, %71 : vector<1x256xi1>, vector<1x256xf32>
    %c1_i32_26 = arith.constant 1 : i32
    %76 = vector.broadcast %c1_i32_26 : i32 to vector<1x256xi32>
    %77 = arith.select %74, %76, %72 : vector<1x256xi1>, vector<1x256xi32>
    %78 = vector.extract_strided_slice %70 {offsets = [2, 0], sizes = [1, 256], strides = [1, 1]} : vector<5x256xf32> to vector<1x256xf32>
    %79 = arith.cmpf ogt, %78, %75 : vector<1x256xf32>
    %80 = arith.select %79, %78, %75 : vector<1x256xi1>, vector<1x256xf32>
    %c2_i32_27 = arith.constant 2 : i32
    %81 = vector.broadcast %c2_i32_27 : i32 to vector<1x256xi32>
    %82 = arith.select %79, %81, %77 : vector<1x256xi1>, vector<1x256xi32>
    %83 = vector.extract_strided_slice %70 {offsets = [3, 0], sizes = [1, 256], strides = [1, 1]} : vector<5x256xf32> to vector<1x256xf32>
    %84 = arith.cmpf ogt, %83, %80 : vector<1x256xf32>
    %85 = arith.select %84, %83, %80 : vector<1x256xi1>, vector<1x256xf32>
    %c3_i32_28 = arith.constant 3 : i32
    %86 = vector.broadcast %c3_i32_28 : i32 to vector<1x256xi32>
    %87 = arith.select %84, %86, %82 : vector<1x256xi1>, vector<1x256xi32>
    %88 = vector.extract_strided_slice %70 {offsets = [4, 0], sizes = [1, 256], strides = [1, 1]} : vector<5x256xf32> to vector<1x256xf32>
    %89 = arith.cmpf ogt, %88, %85 : vector<1x256xf32>
    %c4_i32_29 = arith.constant 4 : i32
    %90 = vector.broadcast %c4_i32_29 : i32 to vector<1x256xi32>
    %91 = arith.select %89, %90, %87 : vector<1x256xi1>, vector<1x256xi32>
    %c0_30 = arith.constant 0 : index
    %c256 = arith.constant 256 : index
    %92 = vector.load %arg3[%c0_30, %c256] : memref<1x512xi32, #tpu.memory_space<vmem>>, vector<1x256xi32>
    tpu.vector_store %arg3[%c0_30, %c256], %91 {strides = array<i32>} : memref<1x512xi32, #tpu.memory_space<vmem>>, vector<1x256xi32>,
    return
  }
}

</mosaic_0001>

<bundles_post_ra>
// kernel: tpu_custom_call.1
= control target key start
LH: loop header
LB: loop body
LE: loop exit
PB: predicated region body
PF: predicated region fallthrough
CT: control target
= control target key end

     0   :  { %8 = vsyncpa [#allocation3], 0  ;;  %s1178_s0 = inlined_call_operand.vmem [shape: bf16[64,32], index: 0, kind: input, shape index: {}]   ;;  %s1179_s1 = inlined_call_operand.hbm [shape: bf16[104,128], index: 1, kind: input, shape index: {}]   ;;  %s1180_s2 = inlined_call_operand.vmem [shape: bf16[16,256], index: 2, kind: input, shape index: {}]   ;;  %s1181_s3 = inlined_call_operand.hbm [shape: s32[1,512], index: 3, kind: output, shape index: {}]  }
   0x1   :  { %9 = vsyncpa [#allocation4], 0  ;;  %s1019_s12 = smov [#allocation2]   ;;  %s971_s16 = scalar_lea.hbm %s1179_s1, 832 }
   0x2   :  { %s17_s13 = sshll.u32 %s1019_s12, 4  ;;  %p972_p0 = scmp.ne.s32.totalorder %s1179_s1, %s971_s16  ;;  %s18_s13 = int_to_ptr.vmem [resolvable:$true] %s17_s13 }
   0x3   :  { %p975_p1 = scmp.lt.u32.totalorder %s971_s16, %s1179_s1 }
   0x5   :  { %p977_p2 = pnand %p975_p1, %p972_p0 }
   0x7   :  { %980 = shalt.err (!%p977_p2)
}
   0x8   :  { %s981_s21 = scalar_lea.vmem %s18_s13, 832  ;;  %p986_p4 = scmp.lt.s32.totalorder %s18_s13, %s18_s13 }
   0x9   :  { %p982_p3 = scmp.ne.s32.totalorder %s18_s13, %s981_s21  ;;  %p987_p5 = scmp.lt.s32.totalorder %s981_s21, %s981_s21 }
   0xb   :  { %p988_p6 = por %p987_p5, %p986_p4 }
   0xd   :  { %p989_p7 = pnand %p988_p6, %p982_p3 }
   0xf   :  { %992 = shalt.err (!%p989_p7)
}
  0x10   :  { %s1020_s22 = smov 64   ;;  %s1021_s23 = smov 4  }
  0x11   :  { %23 = dma.hbm_to_vmem [thread:$0]  %s1179_s1, 832, %s18_s13, [#allocation3], %s1020_s22, %s1020_s22, %s1021_s23  }
  0x12   :  { %1015 = dma.done.wait [#allocation3], 832  }
  0x13   :  { %1016 = vsyncadd [#allocation3], 4294966464  ;;  %v1022_v0 = vmov 40   ;;  %v922_v1 = vld [vmem:[%s1178_s0] sm:$0xff]   ;;  %v923_v2 = vld [vmem:[%s1178_s0 + $0x8] sm:$0xff]   ;;  %vm109_vm0 = vcmask 523264  }
  0x14   :  { %875 = vset.pattern.permute.xlu0 %v1022_v0  ;;  %819 = vmatprep.subr.bf16.mxu0 %v922_v1  ;;  %v924_v3 = vld [vmem:[%s1178_s0 + $0x10] sm:$0xff]   ;;  %v926_v4 = vld [vmem:[#allocation2] sm:$0xff]   ;;  %v36_v6 = vld [vmem:[#allocation2 + $0x18] sm:$0xff]   ;;  %vm227_vm1 = vcmask 261120   ;;  %v1023_v17 = vmov 32   ;;  %v1024_v40 = vmov 41  }
  0x15   :  { %820 = vmatpush3.bf16.msra.mxu0 %v922_v1  ;;  %827 = vmatprep.mubr.msk.bf16.mxu0 %vm109_vm0, %v926_v4  ;;  %v34_v5 = vld [vmem:[#allocation2 + $0x10] sm:$0xff]   ;;  %v53_v9 = vunpack.c.l.bf16 %v36_v6  ;;  %v54_v10 = vunpack.c.h.bf16 %v36_v6  ;;  %v925_v11 = vld [vmem:[%s1178_s0 + $0x18] sm:$0xff]   ;;  %v927_v14 = vld [vmem:[#allocation2 + $0x8] sm:$0xff]   ;;  %vm1026_vm2 = vmmov 0   ;;  %vm528_vm3 = vcmask 130048   ;;  %s1028_s9 = smov 112  }
  0x16   :  { %821 = vmatprep.subr.bf16.mxu0 %v923_v2  ;;  %v51_v7 = vunpack.c.l.bf16 %v34_v5  ;;  %v52_v8 = vunpack.c.h.bf16 %v34_v5  ;;  %835 = vmatprep.mubr.msk.bf16.mxu1 %vm227_vm1, %v34_v5  ;;  %v38_v15 = vld [vmem:[#allocation2 + $0x20] sm:$0xff]   ;;  %v40_v16 = vld [vmem:[#allocation2 + $0x28] sm:$0xff]  }
  0x17   :  { %v881_v13 = vpack.i.bf16 %v54_v10, %v53_v9  ;;  %886 = vset.pattern.permute.xlu1 %v1023_v17  ;;  %v167_v18 = vunpack.c.l.bf16 %v38_v15  ;;  %v168_v19 = vunpack.c.h.bf16 %v38_v15  ;;  %v169_v20 = vunpack.c.l.bf16 %v40_v16 }
  0x18   :  { %v876_v12 = vpack.i.bf16 %v52_v8, %v51_v7  ;;  %v170_v21 = vunpack.c.h.bf16 %v40_v16 }
  0x19   :  { %822 = vmatpush3.bf16.msra.mxu0 %v923_v2  ;;  %v898_v22 = vpack.i.bf16 %v168_v19, %v167_v18 }
  0x1a   :  { %823 = vmatprep.subr.bf16.mxu0 %v924_v3  ;;  %877 = vperm.xlu0 %875, %v876_v12   ;;  %v903_v23 = vpack.i.bf16 %v170_v21, %v169_v20 }
  0x1b   :  { %888 = vperm.xlu1 %886, %v876_v12  }
  0x1d   :  { %824 = vmatpush3.bf16.msra.mxu0 %v924_v3 }
  0x1e   :  { %825 = vmatprep.subr.bf16.mxu0 %v925_v11  ;;  %882 = vperm.xlu0 %875, %v881_v13  }
  0x1f   :  { %893 = vperm.xlu1 %886, %v881_v13  }
  0x21   :  { %826 = vmatpush3.bf16.msra.mxu0 %v925_v11 }
  0x22   :  { %897 = vset.pattern.permute.xlu0 %v1023_v17 }
  0x23   :  { %899 = vperm.xlu0 %897, %v898_v22   ;;  %904 = vperm.xlu1 %886, %v903_v23  }
  0x24   :  { %828 = vmatmul.mubr.msk.bf16.vlgmr.msra.gmra.mrb[0].mxu0 %vm109_vm0, %v927_v14 }
  0x27   :  { %383 = vrot.lane.b32.xlu0 %v927_v14, %s1020_s22  ;;  %381 = vrot.lane.b32.xlu1 %v926_v4, %s1020_s22 }
  0x28   :  { %914 = vset.pattern.permute.xlu0 %v1024_v40  ;;  %908 = vset.pattern.permute.xlu1 %v1024_v40 }
  0x2b   :  { %916 = vperm.xlu0 %914, %v881_v13   ;;  %910 = vperm.xlu1 %908, %v876_v12  }
  0x2f   :  { %920 = vset.pattern.permute.xlu1 %v1023_v17  ;;  %921 = vset.pattern.permute.xlu0 %v1023_v17 }
  0x99   :  { %v878_v24 = vpop.permute.xlu0 %877 }
  0x9a   :  { %v889_v36 = vpop.permute.xlu1 %888 }
  0x9d   :  { %v883_v25 = vpop.permute.xlu0 %882 }
  0x9e   :  { %v894_v37 = vpop.permute.xlu1 %893 }
  0xa2   :  { %v905_v38 = vpop.permute.xlu1 %904  ;;  %v900_v49 = vpop.permute.xlu0 %899 }
  0xa6   :  { %v382_v39 = vpop.permute.xlu1 %381 }
  0xf7   :  { %v829_v26 = vpop.f32.mrb[0].mxu0 }
  0xf8   :  { %v150_v27 = vpop.f32.mrb[1].mxu0  ;;  %v1088_v33 = vadd.low.f32.bf16 %v829_v26, %v883_v25 }
  0xf9   :  { %v830_v28 = vpop.f32.mrb[2].mxu0  ;;  %v1082_v30 = vadd.low.f32.bf16 %v150_v27, %v878_v24 }
  0xfa   :  { %v153_v29 = vpop.f32.mrb[3].mxu0  ;;  %v1084_v31 = vadd.high.f32.bf16 %v830_v28, %v883_v25 }
  0xfb   :  { %v1086_v32 = vadd.high.f32.bf16 %v153_v29, %v878_v24 }
  0xfc   :  { %v166_v35 = vpack.c.bf16 %v1084_v31, %v1088_v33 }
  0xfd   :  { %v165_v34 = vpack.c.bf16 %v1086_v32, %v1082_v30 }
  0xff   :  { %831 = vmatprep.subr.bf16.mxu1 %v165_v34 }
 0x100   :  { %832 = vmatpush3.bf16.msra.mxu1 %v165_v34 }
 0x101   :  { %833 = vmatprep.subr.bf16.mxu1 %v166_v35 }
 0x104   :  { %834 = vmatpush3.bf16.msra.mxu1 %v166_v35 }
 0x107   :  { %836 = vmatmul.mubr.msk.bf16.vlgmr.msra.gmra.mrb[0].mxu1 %vm227_vm1, %v36_v6 }
 0x108   :  { %839 = vmatprep.mubr.msk.bf16.mxu1 %vm227_vm1, %v38_v15 }
 0x10f   :  { %840 = vmatmul.mubr.msk.bf16.gmra.mrb[4].mxu1 %vm227_vm1, %v40_v16 }
 0x110   :  { %851 = vmatprep.mubr.msk.bf16.mxu1 %vm109_vm0, %v382_v39 }
 0x1da   :  { %v837_v41 = vpop.f32.mrb[0].mxu1 }
 0x1db   :  { %v1098_v42 = vadd.low.f32.bf16 %v837_v41, %v894_v37  ;;  %v274_v43 = vpop.f32.mrb[1].mxu1 }
 0x1dc   :  { %v1100_v44 = vadd.low.f32.bf16 %v274_v43, %v889_v36  ;;  %v838_v45 = vpop.f32.mrb[2].mxu1 }
 0x1dd   :  { %v315_v46 = vmul.f32 0.044715, %v1098_v42  ;;  %v1103_v47 = vadd.high.f32.bf16 %v838_v45, %v894_v37  ;;  %v277_v48 = vpop.f32.mrb[3].mxu1 }
 0x1de   :  { %v313_v50 = vmul.f32 0.044715, %v1100_v44  ;;  %v1106_v51 = vadd.high.f32.bf16 %v277_v48, %v889_v36 }
 0x1df   :  { %v323_v52 = vmul.f32 %v1098_v42, %v315_v46  ;;  %v316_v53 = vmul.f32 0.044715, %v1103_v47  ;;  %v307_v46 = vmul.f32 0.5, %v1098_v42  ;;  %v308_v48 = vmul.f32 0.5, %v1103_v47 }
 0x1e0   :  { %v321_v54 = vmul.f32 %v1100_v44, %v313_v50  ;;  %v314_v55 = vmul.f32 0.044715, %v1106_v51  ;;  %v305_v50 = vmul.f32 0.5, %v1100_v44 }
 0x1e1   :  { %v331_v56 = vmul.f32 %v1098_v42, %v323_v52  ;;  %v324_v57 = vmul.f32 %v1103_v47, %v316_v53  ;;  %v306_v52 = vmul.f32 0.5, %v1106_v51 }
 0x1e2   :  { %v329_v58 = vmul.f32 %v1100_v44, %v321_v54  ;;  %v322_v59 = vmul.f32 %v1106_v51, %v314_v55  ;;  %v841_v60 = vpop.f32.mrb[4].mxu1 }
 0x1e3   :  { %v332_v61 = vmul.f32 %v1103_v47, %v324_v57  ;;  %v1117_v62 = vadd.low.f32.bf16 %v841_v60, %v905_v38  ;;  %v290_v63 = vpop.f32.mrb[5].mxu1  ;;  %v339_v0 = vadd.f32 %v1098_v42, %v331_v56 }
 0x1e4   :  { %v330_v1 = vmul.f32 %v1106_v51, %v322_v59  ;;  %v1121_v2 = vadd.low.f32.bf16 %v290_v63, %v900_v49  ;;  %v842_v3 = vpop.f32.mrb[6].mxu1  ;;  %v337_v4 = vadd.f32 %v1100_v44, %v329_v58 }
 0x1e5   :  { %v319_v5 = vmul.f32 0.044715, %v1117_v62  ;;  %v965_v6 = vadd.high.f32.bf16 %v842_v3, %v905_v38  ;;  %v293_v7 = vpop.f32.mrb[7].mxu1  ;;  %v340_v8 = vadd.f32 %v1103_v47, %v332_v61  ;;  %v347_v9 = vmul.f32 0.7978846, %v339_v0 }
 0x1e6   :  { %v317_v10 = vmul.f32 0.044715, %v1121_v2  ;;  %v966_v11 = vadd.high.f32.bf16 %v293_v7, %v900_v49  ;;  %v338_v12 = vadd.f32 %v1106_v51, %v330_v1  ;;  %v345_v13 = vmul.f32 0.7978846, %v337_v4 }
 0x1e7   :  { %v327_v14 = vmul.f32 %v1117_v62, %v319_v5  ;;  %v320_v15 = vmul.f32 0.044715, %v965_v6  ;;  %v348_v16 = vmul.f32 0.7978846, %v340_v8  ;;  %939 = vtanh.f32 %v347_v9 }
 0x1e8   :  { %v325_v17 = vmul.f32 %v1121_v2, %v317_v10  ;;  %v318_v18 = vmul.f32 0.044715, %v966_v11  ;;  %v346_v19 = vmul.f32 0.7978846, %v338_v12  ;;  %941 = vtanh.f32 %v345_v13 }
 0x1e9   :  { %v335_v20 = vmul.f32 %v1117_v62, %v327_v14  ;;  %v328_v21 = vmul.f32 %v965_v6, %v320_v15  ;;  %943 = vtanh.f32 %v348_v16  ;;  %v311_v47 = vmul.f32 0.5, %v1117_v62  ;;  %v384_v14 = vpop.permute.xlu0 %383  ;;  %v911_v15 = vpop.permute.xlu1 %910 }
 0x1ea   :  { %v333_v22 = vmul.f32 %v1121_v2, %v325_v17  ;;  %v326_v23 = vmul.f32 %v966_v11, %v318_v18  ;;  %945 = vtanh.f32 %v346_v19  ;;  %v312_v44 = vmul.f32 0.5, %v965_v6 }
 0x1eb   :  { %v336_v24 = vmul.f32 %v965_v6, %v328_v21  ;;  %v343_v25 = vadd.f32 %v1117_v62, %v335_v20  ;;  %v309_v51 = vmul.f32 0.5, %v1121_v2  ;;  %v310_v4 = vmul.f32 0.5, %v966_v11 }
 0x1ec   :  { %v334_v26 = vmul.f32 %v966_v11, %v326_v23  ;;  %v341_v27 = vadd.f32 %v1121_v2, %v333_v22  ;;  %v1025_v62 = vmov 0.0   ;;  %v42_v2 = vld [vmem:[#allocation2 + $0x30] sm:$0x7] }
 0x1ed   :  { %v344_v28 = vadd.f32 %v965_v6, %v336_v24  ;;  %v351_v29 = vmul.f32 0.7978846, %v343_v25  ;;  %855 = vmatprep.subr.bf16.mxu0 %v1025_v62  ;;  %859 = vmatprep.mubr.msk.bf16.mxu0 %vm1026_vm2, %v1025_v62  ;;  %v466_v6 = vunpack.c.l.bf16 %v42_v2 }
 0x1ee   :  { %v342_v34 = vadd.f32 %v966_v11, %v334_v26  ;;  %v349_v35 = vmul.f32 0.7978846, %v341_v27  ;;  %v917_v11 = vpop.permute.xlu0 %916 }
 0x1ef   :  { %v352_v36 = vmul.f32 0.7978846, %v344_v28  ;;  %947 = vtanh.f32 %v351_v29  ;;  %469 = vperm.xlu1 %920, %v466_v6  }
 0x1f0   :  { %v350_v37 = vmul.f32 0.7978846, %v342_v34  ;;  %949 = vtanh.f32 %v349_v35 }
 0x1f1   :  { %v940_v38 = vpop.eup %939  ;;  %951 = vtanh.f32 %v352_v36 }
 0x1f2   :  { %v942_v39 = vpop.eup %941  ;;  %v363_v40 = vadd.f32 1.0, %v940_v38  ;;  %953 = vtanh.f32 %v350_v37 }
 0x1f3   :  { %v944_v41 = vpop.eup %943  ;;  %v361_v43 = vadd.f32 1.0, %v942_v39 }
 0x1f4   :  { %v946_v45 = vpop.eup %945  ;;  %v364_v49 = vadd.f32 1.0, %v944_v41  ;;  %v371_v54 = vmul.f32 %v363_v40, %v307_v46 }
 0x1f5   :  { %v362_v53 = vadd.f32 1.0, %v946_v45  ;;  %v369_v56 = vmul.f32 %v361_v43, %v305_v50 }
 0x1f6   :  { %v372_v55 = vmul.f32 %v364_v49, %v308_v48 }
 0x1f7   :  { %v370_v57 = vmul.f32 %v362_v53, %v306_v52 }
 0x1f8   :  { %v378_v58 = vpack.c.bf16 %v372_v55, %v371_v54 }
 0x1f9   :  { %v948_v59 = vpop.eup %947  ;;  %v377_v60 = vpack.c.bf16 %v370_v57, %v369_v56 }
 0x1fa   :  { %v950_v61 = vpop.eup %949  ;;  %v367_v63 = vadd.f32 1.0, %v948_v59  ;;  %v1029_v59 = vmov 1966171168  }
 0x1fb   :  { %v952_v0 = vpop.eup %951  ;;  %843 = vmatprep.subr.bf16.mxu1 %v377_v60  ;;  %v365_v42 = vadd.f32 1.0, %v950_v61 }
 0x1fc   :  { %v954_v1 = vpop.eup %953  ;;  %844 = vmatpush3.bf16.msra.mxu1 %v377_v60  ;;  %v368_v3 = vadd.f32 1.0, %v952_v0  ;;  %v375_v7 = vmul.f32 %v367_v63, %v311_v47  ;;  %v627_v60 = vunpack.c.l.s4 %v1029_v59  ;;  %v629_v0 = vlaneseq }
 0x1fd   :  { %845 = vmatprep.subr.bf16.mxu1 %v378_v58  ;;  %v366_v5 = vadd.f32 1.0, %v954_v1  ;;  %v373_v9 = vmul.f32 %v365_v42, %v309_v51 }
 0x1fe   :  { %v376_v8 = vmul.f32 %v368_v3, %v312_v44  ;;  %vm1156_vm12 = vcmp.lt.s32.totalorder %v629_v0, 256 }
 0x1ff   :  { %v374_v10 = vmul.f32 %v366_v5, %v310_v4  ;;  %v628_v4 = vunpack.c.0.s8 %v627_v60 }
 0x200   :  { %846 = vmatpush3.bf16.msra.mxu1 %v378_v58  ;;  %v380_v12 = vpack.c.bf16 %v376_v8, %v375_v7  ;;  %v630_v8 = vshrl.u32 %v629_v0, 7 }
 0x201   :  { %v379_v13 = vpack.c.bf16 %v374_v10, %v373_v9 }
 0x202   :  { %v631_v6 = vsub.s32 %v628_v4, %v630_v8 }
 0x203   :  { %847 = vmatprep.subr.bf16.mxu1 %v379_v13 }
 0x204   :  { %848 = vmatpush3.bf16.msra.mxu1 %v379_v13 }
 0x205   :  { %849 = vmatprep.subr.bf16.mxu1 %v380_v12 }
 0x208   :  { %850 = vmatpush3.bf16.msra.mxu1 %v380_v12 }
 0x20b   :  { %852 = vmatmul.mubr.msk.bf16.vlgmr.msra.gmra.mrb[8].mxu1 %vm109_vm0, %v384_v14 }
 0x2de   :  { %v853_v16 = vpop.f32.mrb[8].mxu1 }
 0x2df   :  { %v442_v17 = vadd.f32 %v1088_v33, %v853_v16  ;;  %v425_v18 = vpop.f32.mrb[9].mxu1  ;;  %v470_v33 = vpop.permute.xlu1 %469 }
 0x2e0   :  { %v440_v19 = vadd.f32 %v1082_v30, %v425_v18  ;;  %v854_v20 = vpop.f32.mrb[10].mxu1  ;;  %v932_v30 = vld [vmem:[%s1180_s2] ss:$8 sps:$4 sm:$0xff]  }
 0x2e1   :  { %v443_v21 = vadd.f32 %v1084_v31, %v854_v20  ;;  %v428_v22 = vpop.f32.mrb[11].mxu1  ;;  %v967_v24 = vadd.low.f32.bf16 %v442_v17, %v917_v11  ;;  %v934_v31 = vld [vmem:[%s1180_s2 + $0x4] ss:$8 sps:$4 sm:$0xff]   ;;  %s1030_s2 = smov [#allocation5]  }
 0x2e2   :  { %v441_v23 = vadd.f32 %v1086_v32, %v428_v22  ;;  %v969_v26 = vadd.low.f32.bf16 %v440_v19, %v911_v15  ;;  %v1027_v32 = vmov 0   ;;  %651 = vmatprep.subr.bf16.mxu1 %v934_v31  ;;  %s766_s10 = sshll.u32 %s1030_s2, 4  ;;  %s767_s10 = int_to_ptr.vmem [resolvable:$true] %s766_s10 }
 0x2e3   :  { %v968_v25 = vadd.high.f32.bf16 %v443_v21, %v917_v11  ;;  %683 = vmatprep.mubr.bf16.mxu1 %v1027_v32  ;;  %652 = vmatpush1.bf16.msra.mxu1 %v932_v30  ;;  %s993_s11 = scalar_lea.vmem %s767_s10, 64  ;;  %p998_p9 = scmp.lt.s32.totalorder %s767_s10, %s767_s10 }
 0x2e4   :  { %v970_v27 = vadd.high.f32.bf16 %v441_v23, %v911_v15  ;;  %p994_p8 = scmp.ne.s32.totalorder %s767_s10, %s993_s11  ;;  %p999_p10 = scmp.lt.s32.totalorder %s993_s11, %s993_s11 }
 0x2e5   :  { %v465_v28 = vpack.c.bf16 %v968_v25, %v967_v24 }
 0x2e6   :  { %v464_v29 = vpack.c.bf16 %v970_v27, %v969_v26  ;;  %p1000_p11 = por %p999_p10, %p998_p9 }
 0x2e8   :  { %856 = vmatpush3.bf16.msra.mxu0 %v464_v29  ;;  %p1001_p12 = pnand %p1000_p11, %p994_p8 }
 0x2e9   :  { %857 = vmatprep.subr.bf16.mxu0 %v1025_v62 }
 0x2ec   :  { %858 = vmatpush3.bf16.msra.mxu0 %v465_v28 }
 0x2ed   :  { %532 = vmatprep.subr.bf16.mxu0 %v934_v31 }
 0x2ef   :  { %860 = vmatmul.mubr.msk.bf16.vlgmr.msra.gmra.mrb[4].mxu0 %vm227_vm1, %v42_v2 }
 0x2f0   :  { %564 = vmatprep.mubr.bf16.mxu0 %v1027_v32  ;;  %533 = vmatpush1.bf16.msra.mxu0 %v932_v30 }
 0x3c2   :  { %v509_v34 = vpop.f32.mrb[4].mxu0 }
 0x3c3   :  { %v510_v35 = vadd.f32 %v509_v34, %v470_v33  ;;  %v861_v36 = vpop.f32.mrb[5].mxu0 }
 0x3c4   :  { %v512_v37 = vpop.f32.mrb[6].mxu0 }
 0x3c5   :  { %v517_v38 = vpack.c.bf16 %v510_v35, %v510_v35  ;;  %v862_v39 = vpop.f32.mrb[7].mxu0 }
 0x3c7   :  { %646 = vrot.lane.b32.xlu1 %v517_v38, %s1028_s9  ;;  %796 = vmatmul.mubr.msk.bf16.vlgmr.msra.gmra.mrb[8].mxu0 %vm528_vm3, %v517_v38 }
 0x439   :  { %v647_v40 = vpop.permute.xlu1 %646 }
 0x43a   :  { %797 = vmatmul.mubr.msk.bf16.vlgmr.msra.gmra.mrb[12].mxu1 %vm528_vm3, %v647_v40 }
 0x49a   :  { %v566_v41 = vpop.f32.mrb[8].mxu0 }
 0x49b   :  { %v575_v43 = vrot.slane %v566_v41, 7  ;;  %v568_v45 = vpop.f32.mrb[9].mxu0 }
 0x49c   :  { %v576_v46 = vrot.slane %v568_v45, 7  ;;  %v570_v48 = vpop.f32.mrb[10].mxu0 }
 0x49d   :  { %vm579_vm4 = vcmp.gt.f32.partialorder %v566_v41, %v575_v43  ;;  %v571_v49 = vpop.f32.mrb[11].mxu0 }
 0x49e   :  { %v581_v50 = vsel %vm579_vm4, %v566_v41, %v575_v43  ;;  %vm580_vm5 = vcmp.gt.f32.partialorder %v568_v45, %v576_v46  ;;  %v583_v52 = vsel %vm579_vm4, 1, %v1027_v32 }
 0x49f   :  { %v587_v53 = vrot.slane %v581_v50, 7  ;;  %v582_v54 = vsel %vm580_vm5, %v568_v45, %v576_v46  ;;  %v584_v55 = vsel %vm580_vm5, 1, %v1027_v32  ;;  %v595_v56 = vrot.slane %v583_v52, 7 }
 0x4a0   :  { %v588_v57 = vrot.slane %v582_v54, 7  ;;  %v596_v58 = vrot.slane %v584_v55, 7 }
 0x4a1   :  { %vm591_vm6 = vcmp.gt.f32.partialorder %v566_v41, %v587_v53 }
 0x4a2   :  { %vm592_vm7 = vcmp.gt.f32.partialorder %v568_v45, %v588_v57  ;;  %v593_v61 = vsel %vm591_vm6, %v566_v41, %v587_v53  ;;  %v597_v63 = vsel %vm591_vm6, 2, %v595_v56 }
 0x4a3   :  { %v594_v42 = vsel %vm592_vm7, %v568_v45, %v588_v57  ;;  %v598_v1 = vsel %vm592_vm7, 2, %v596_v58  ;;  %v601_v47 = vrot.slane %v593_v61, 7  ;;  %v609_v44 = vrot.slane %v597_v63, 7 }
 0x4a4   :  { %v602_v3 = vrot.slane %v594_v42, 7  ;;  %v610_v51 = vrot.slane %v598_v1, 7 }
 0x4a5   :  { %vm605_vm8 = vcmp.gt.f32.partialorder %v566_v41, %v601_v47 }
 0x4a6   :  { %vm606_vm9 = vcmp.gt.f32.partialorder %v568_v45, %v602_v3  ;;  %v607_v5 = vsel %vm605_vm8, %v566_v41, %v601_v47  ;;  %v611_v7 = vsel %vm605_vm8, 3, %v609_v44 }
 0x4a7   :  { %v608_v9 = vsel %vm606_vm9, %v568_v45, %v602_v3  ;;  %v612_v10 = vsel %vm606_vm9, 3, %v610_v51  ;;  %v615_v12 = vrot.slane %v607_v5, 7  ;;  %v621_v13 = vrot.slane %v611_v7, 7 }
 0x4a8   :  { %v616_v14 = vrot.slane %v608_v9, 7  ;;  %v622_v62 = vrot.slane %v612_v10, 7 }
 0x4a9   :  { %vm619_vm10 = vcmp.gt.f32.partialorder %v566_v41, %v615_v12 }
 0x4aa   :  { %vm620_vm11 = vcmp.gt.f32.partialorder %v568_v45, %v616_v14  ;;  %v623_v2 = vsel %vm619_vm10, 4, %v621_v13 }
 0x4ab   :  { %v624_v11 = vsel %vm620_vm11, 4, %v622_v62 }
 0x4ac   :  { %v625_v15 = vcombine.high %v623_v2, %v624_v11 }
 0x4ae   :  { %v632_v16 = vrot.slane %v625_v15, %v631_v6 }
 0x4b0   :  { %v639_v18 = vrot.slane %v632_v16, %v631_v6 }
 0x4b2   :  { %644 = vst.msk [vmem:[#allocation5] sm:$0x3] %vm1156_vm12, %v639_v18 }
 0x50d   :  { %v685_v19 = vpop.f32.mrb[12].mxu1 }
 0x50e   :  { %v694_v20 = vrot.slane %v685_v19, 7  ;;  %v687_v21 = vpop.f32.mrb[13].mxu1 }
 0x50f   :  { %v695_v22 = vrot.slane %v687_v21, 7  ;;  %v689_v23 = vpop.f32.mrb[14].mxu1 }
 0x510   :  { %vm698_vm13 = vcmp.gt.f32.partialorder %v685_v19, %v694_v20  ;;  %v690_v24 = vpop.f32.mrb[15].mxu1 }
 0x511   :  { %v700_v25 = vsel %vm698_vm13, %v685_v19, %v694_v20  ;;  %vm699_vm14 = vcmp.gt.f32.partialorder %v687_v21, %v695_v22  ;;  %v702_v26 = vsel %vm698_vm13, 1, %v1027_v32 }
 0x512   :  { %v706_v27 = vrot.slane %v700_v25, 7  ;;  %v701_v28 = vsel %vm699_vm14, %v687_v21, %v695_v22  ;;  %v703_v29 = vsel %vm699_vm14, 1, %v1027_v32  ;;  %v714_v30 = vrot.slane %v702_v26, 7 }
 0x513   :  { %v707_v31 = vrot.slane %v701_v28, 7  ;;  %v715_v33 = vrot.slane %v703_v29, 7 }
 0x514   :  { %vm710_vm15 = vcmp.gt.f32.partialorder %v685_v19, %v706_v27 }
 0x515   :  { %vm711_vm0 = vcmp.gt.f32.partialorder %v687_v21, %v707_v31  ;;  %v712_v34 = vsel %vm710_vm15, %v685_v19, %v706_v27  ;;  %v716_v35 = vsel %vm710_vm15, 2, %v714_v30 }
 0x516   :  { %v713_v36 = vsel %vm711_vm0, %v687_v21, %v707_v31  ;;  %v717_v37 = vsel %vm711_vm0, 2, %v715_v33  ;;  %v720_v38 = vrot.slane %v712_v34, 7  ;;  %v728_v39 = vrot.slane %v716_v35, 7 }
 0x517   :  { %v721_v40 = vrot.slane %v713_v36, 7  ;;  %v729_v41 = vrot.slane %v717_v37, 7 }
 0x518   :  { %vm724_vm1 = vcmp.gt.f32.partialorder %v685_v19, %v720_v38 }
 0x519   :  { %vm725_vm2 = vcmp.gt.f32.partialorder %v687_v21, %v721_v40  ;;  %v726_v43 = vsel %vm724_vm1, %v685_v19, %v720_v38  ;;  %v730_v45 = vsel %vm724_vm1, 3, %v728_v39 }
 0x51a   :  { %v727_v46 = vsel %vm725_vm2, %v687_v21, %v721_v40  ;;  %v731_v48 = vsel %vm725_vm2, 3, %v729_v41  ;;  %v734_v32 = vrot.slane %v726_v43, 7  ;;  %v740_v49 = vrot.slane %v730_v45, 7 }
 0x51b   :  { %v735_v50 = vrot.slane %v727_v46, 7  ;;  %v741_v52 = vrot.slane %v731_v48, 7 }
 0x51c   :  { %vm738_vm3 = vcmp.gt.f32.partialorder %v685_v19, %v734_v32 }
 0x51d   :  { %vm739_vm4 = vcmp.gt.f32.partialorder %v687_v21, %v735_v50  ;;  %v742_v53 = vsel %vm738_vm3, 4, %v740_v49 }
 0x51e   :  { %v743_v54 = vsel %vm739_vm4, 4, %v741_v52 }
 0x51f   :  { %v744_v55 = vcombine.high %v742_v53, %v743_v54 }
 0x521   :  { %v751_v56 = vrot.slane %v744_v55, %v631_v6 }
 0x523   :  { %v758_v57 = vrot.slane %v751_v56, %v631_v6 }
 0x525   :  { %759 = vst.msk [vmem:[#allocation5 + $0x2] sm:$0x3] %vm1156_vm12, %v758_v57 }
 0x526   :  { %1004 = shalt.err (!%p1001_p12)
}
 0x527   :  { %s1005_s14 = scalar_lea.hbm %s1181_s3, 64 }
 0x528   :  { %p1006_p13 = scmp.ne.s32.totalorder %s1181_s3, %s1005_s14  ;;  %p1009_p0 = scmp.lt.u32.totalorder %s1005_s14, %s1181_s3 }
 0x52a   :  { %p1011_p1 = pnand %p1009_p0, %p1006_p13 }
 0x52c   :  { %1014 = shalt.err (!%p1011_p1)
}
 0x52d   :  { %769 = dma.vmem_to_hbm [thread:$0]  %s767_s10, 64, %s1181_s3, [#allocation4]  }
 0x52e   :  { %1017 = dma.done.wait [#allocation4], 64  }
 0x52f   :  { %1018 = vsyncadd [#allocation4], 4294967232 }
 0x530   :  { %773 = vsyncpa [#allocation3], 1 }
 0x531   :  { %774 = vsyncpa [#allocation4], 1 }

</bundles_post_ra>
